<compile_context>
chip_gen: v7x
topology: tpu7x:2x2x1
jax: 0.10.0
libtpu: 0.0.40
codegen_flags: <defaults>
</compile_context>

<pallas_src>
from math import sqrt

import numpy as np
import jax
import jax.numpy as jnp
from jax.experimental import pallas as pl
from jax.experimental.pallas import tpu as pltpu


def _round_up(a: int, m: int) -> int:
    return ((a + m - 1) // m) * m


def _pad2d(a, rows, cols, dtype):
    a = a.astype(dtype)
    r, c = a.shape
    if (r, c) == (rows, cols):
        return a
    return jnp.zeros((rows, cols), dtype).at[:r, :c].set(a)


def _make_kernel(scale: float):
    """Fused EqualLinear kernel body. `scale`=sqrt(2/in_dim), compile-time const."""

    def kernel(x_ref, w_ref, b_ref, o_ref):
        # x_ref: (tm, tk) compute dtype; w_ref: (tk, tn) compute dtype (K-major,
        # pre-transposed at build time); b_ref: (1, tn) f32; o_ref: (tm, tn) f32.
        # o_ref is resident across the K axis (same block index every k step),
        # so it doubles as the f32 accumulator -- no separate VMEM scratch.
        k = pl.program_id(2)
        part = jnp.dot(x_ref[...], w_ref[...], preferred_element_type=jnp.float32)

        @pl.when(k == 0)
        def _first():
            o_ref[...] = part

        @pl.when(k > 0)
        def _accum():
            o_ref[...] += part

        @pl.when(k == pl.num_programs(2) - 1)
        def _finalize():
            # Equal-LR scale + bias applied once on the full f32 sum.
            # Kept in f32 (v5e has no bf16 VPU).
            o_ref[...] = o_ref[...] * scale + b_ref[...]

    return kernel


def _derive_vmem_limit(tm, tk, tn, x_bytes, w_bytes):
    tile_bytes = (
        2 * tm * tk * x_bytes    # x tile, double-buffered
        + 2 * tk * tn * w_bytes  # W tile, double-buffered (the big one)
        + 2 * tn * 4             # bias row, double-buffered
        + 2 * tm * tn * 4        # f32 output / accumulator tile
    )
    # 2x margin for compiler-internal scratch; clamp so we never ask for more
    # than a comfortable fraction of v7x's 64 MiB physical VMEM.
    return int(min(max(2 * tile_bytes, 8 * 1024 * 1024), 48 * 1024 * 1024))


def build_fused_equal_linear(weights, biases, *, compute_dtype=jnp.bfloat16,
                             tk=None, tn=None):
    """Build a fused EqualLinear apply function.

    weights: list of (N_l, K) arrays in PyTorch (out, in) layout, all sharing K.
    biases:  list of (N_l,) arrays.
    Returns apply(x) -> tuple of per-layer (B, N_l) f32 outputs where
        y_l = x @ (W_l * sqrt(2 / K)).T + b_l.

    All weight-side work (concat, transpose to K-major, zero-pad to lane/tile
    multiples, cast to the MXU compute dtype) happens ONCE here, at build time.
    """
    weights = [jnp.asarray(w, jnp.float32) for w in weights]
    biases = [jnp.asarray(b, jnp.float32) for b in biases]
    K = int(weights[0].shape[1])
    out_dims = []
    for w, b in zip(weights, biases):
        assert int(w.shape[1]) == K, "fused EqualLinears must share in_dim"
        assert b.shape == (w.shape[0],)
        out_dims.append(int(w.shape[0]))
    n_total = sum(out_dims)
    scale = float(sqrt(2.0 / K))  # EqualLR scale; identical for all fused layers.

    itemsize = int(np.dtype(compute_dtype).itemsize)
    row_align = 8 * max(1, 4 // itemsize)  # f32 -> 8 rows, bf16 -> 16 rows

    # ---- one-time weight preparation (hoisted out of the per-call path) ----
    Kp = _round_up(K, 128)
    Np = _round_up(n_total, 128)
    if tk is None:
        tk = min(Kp, 1024)
    Kp = _round_up(Kp, tk)
    if tn is None:
        tn = min(Np, 1024)
        if Np // tn < 2 and Np >= 256:
            # Give the (parallel) N axis >= 2 blocks so both v7x TensorCores
            # have work; on 1-TC chips this only adds one cheap grid step.
            tn = _round_up(Np // 2, 128)
    Np = _round_up(Np, tn)

    w_cat = jnp.concatenate(weights, axis=0)                 # (n_total, K)
    b_cat = jnp.concatenate(biases, axis=0)                  # (n_total,)
    w_t = _pad2d(w_cat.T, Kp, Np, compute_dtype)             # (Kp, Np) K-major
    b_p = _pad2d(b_cat.reshape(1, n_total), 1, Np, jnp.float32)

    split_points, acc = [], 0
    for n in out_dims[:-1]:
        acc += n
        split_points.append(acc)

    @jax.jit
    def apply(x, w_t, b_p):
        B = x.shape[0]
        Mp = _round_up(max(B, 1), row_align)
        tm = Mp                                              # no M tiling: M tiny
        x_p = _pad2d(x, Mp, Kp, compute_dtype)

        grid = (Mp // tm, Np // tn, Kp // tk)
        cost = pl.CostEstimate(
            flops=2 * B * n_total * K,
            transcendentals=0,
            bytes_accessed=int(
                x_p.size * x_p.dtype.itemsize
                + w_t.size * w_t.dtype.itemsize
                + b_p.size * 4
                + Mp * Np * 4
            ),
        )
        out = pl.pallas_call(
            _make_kernel(scale),
            out_shape=jax.ShapeDtypeStruct((Mp, Np), jnp.float32),
            grid_spec=pltpu.PrefetchScalarGridSpec(
                num_scalar_prefetch=0,
                grid=grid,
                in_specs=[
                    pl.BlockSpec((tm, tk), lambda i, j, k: (i, k)),  # x tile
                    pl.BlockSpec((tk, tn), lambda i, j, k: (k, j)),  # W^T tile
                    pl.BlockSpec((1, tn), lambda i, j, k: (0, j)),   # bias row
                ],
                out_specs=pl.BlockSpec((tm, tn), lambda i, j, k: (i, j)),
            ),
            compiler_params=pltpu.CompilerParams(
                dimension_semantics=("parallel", "parallel", "arbitrary"),
                vmem_limit_bytes=_derive_vmem_limit(tm, tk, tn, itemsize, itemsize),
            ),
            cost_estimate=cost,
        )(x_p, w_t, b_p)

        y = out[:B, :n_total]
        if split_points:
            return tuple(jnp.split(y, split_points, axis=1))
        return (y,)

    return lambda x: apply(x, w_t, b_p)


def build_equal_linear(weight_orig, bias, **kw):
    """Single-layer EqualLinear: y = x @ (W * sqrt(2/in_dim)).T + b."""
    fused = build_fused_equal_linear([weight_orig], [bias], **kw)
    return lambda x: fused(x)[0]


def _ref_equal_linear(x, weight_orig, bias):
    """Pure-JAX reference of the EqualLinear forward (f32 semantics)."""
    return x @ (weight_orig * sqrt(2.0 / weight_orig.shape[1])).T + bias


if __name__ == "__main__":
    key = jax.random.PRNGKey(0)

    # AFlowNet style path: style = concat(cond_style, image_style) -> (B, 256).
    # Per pyramid level, the ModulatedConv2d style-MLPs (all EqualLinear(256, *)):
    #   netStyle[i].conv0 -> 256, netStyle[i].conv1 -> 49,
    #   netF[i].conv0     -> 49,  netF[i].conv1     -> 128.
    B, latent_dim, num_pyramid = 2, 256, 2
    per_level_out = [256, 49, 49, 128]
    out_dims = per_level_out * num_pyramid

    keys = jax.random.split(key, 2 * len(out_dims) + 1)
    style = jax.random.normal(keys[0], (B, latent_dim), dtype=jnp.float32)
    weights, biases = [], []
    for li, n in enumerate(out_dims):
        weights.append(jax.random.normal(keys[1 + 2 * li], (n, latent_dim),
                                         dtype=jnp.float32))
        # PyTorch inits these biases to zero; small random values here so the
        # kernel's bias path is actually exercised (same forward formula).
        biases.append(0.1 * jax.random.normal(keys[2 + 2 * li], (n,),
                                              dtype=jnp.float32))

    refs = [_ref_equal_linear(style, w, b) for w, b in zip(weights, biases)]

    # f32 MXU path: exact EqualLinear semantics, tight check.
    fused_f32 = build_fused_equal_linear(weights, biases, compute_dtype=jnp.float32)
    ys_f32 = fused_f32(style)
    jax.block_until_ready(ys_f32)
    for y, r, n in zip(ys_f32, refs, out_dims):
        assert y.shape == (B, n)
        assert jnp.allclose(y, r, atol=1e-4, rtol=1e-4)

    # bf16 MXU path (default): f32 accumulation + f32 epilogue, loose check.
    fused_bf16 = build_fused_equal_linear(weights, biases)
    ys_bf16 = fused_bf16(style)
    jax.block_until_ready(ys_bf16)
    for y, r in zip(ys_bf16, refs):
        assert jnp.allclose(y, r, atol=5e-2, rtol=5e-2)

    # Single-layer convenience wrapper (unaligned out_dim = 49).
    single = build_equal_linear(weights[1], biases[1])
    y_single = single(style)
    jax.block_until_ready(y_single)
    assert y_single.shape == (B, 49)
    assert jnp.allclose(y_single, refs[1], atol=5e-2, rtol=5e-2)

    print("KERNEL_OK")
</pallas_src>

<mosaic_0001>
module attributes {stable_mosaic.version = 11 : i64} {
  func.func @kernel(%arg0: i32, %arg1: i32, %arg2: i32, %arg3: memref<8x256xf32, #tpu.memory_space<vmem>>, %arg4: memref<256x512xf32, #tpu.memory_space<vmem>>, %arg5: memref<1x512xf32, #tpu.memory_space<vmem>>, %arg6: memref<8x512xf32, #tpu.memory_space<vmem>>) attributes {dimension_semantics = [#tpu.dimension_semantics<parallel>, #tpu.dimension_semantics<parallel>, #tpu.dimension_semantics<arbitrary>], iteration_bounds = array<i64: 1, 2, 1>, scalar_prefetch = 0 : i64, scratch_operands = 0 : i64, tpu.core_type = #tpu.core_type<tc>, window_params = [{transform_indices = @transform_0, window_bounds = array<i64: 8, 256>}, {transform_indices = @transform_1, window_bounds = array<i64: 256, 512>}, {transform_indices = @transform_2, window_bounds = array<i64: 1, 512>}, {transform_indices = @transform_3, window_bounds = array<i64: 8, 512>}]} {
    %c0 = arith.constant 0 : index
    %c0_0 = arith.constant 0 : index
    %0 = vector.load %arg3[%c0, %c0_0] : memref<8x256xf32, #tpu.memory_space<vmem>>, vector<8x256xf32>
    %c0_1 = arith.constant 0 : index
    %c0_2 = arith.constant 0 : index
    %1 = vector.load %arg4[%c0_1, %c0_2] : memref<256x512xf32, #tpu.memory_space<vmem>>, vector<256x512xf32>
    %cst = arith.constant dense<0.000000e+00> : vector<8x512xf32>
    %2 = tpu.matmul %0, %1, %cst {dimension_numbers = #tpu.dot_dimension_numbers<[1], [0], [0], [1], [0, 0, 1, 1], [], []>} : vector<8x256xf32>, vector<256x512xf32>, vector<8x512xf32> -> vector<8x512xf32>
    %c0_i32 = arith.constant 0 : i32
    %3 = arith.cmpi eq, %arg2, %c0_i32 : i32
    %4 = arith.extui %3 : i1 to i32
    %c0_i32_3 = arith.constant 0 : i32
    %5 = arith.cmpi ne, %4, %c0_i32_3 : i32
    scf.if %5 {
      %c0_8 = arith.constant 0 : index
      %c0_9 = arith.constant 0 : index
      %12 = vector.load %arg6[%c0_8, %c0_9] : memref<8x512xf32, #tpu.memory_space<vmem>>, vector<8x512xf32>
      tpu.vector_store %arg6[%c0_8, %c0_9], %2 {strides = array<i32>} : memref<8x512xf32, #tpu.memory_space<vmem>>, vector<8x512xf32>,
    } else {
    }
    %c0_i32_4 = arith.constant 0 : i32
    %6 = arith.cmpi sgt, %arg2, %c0_i32_4 : i32
    %7 = arith.extui %6 : i1 to i32
    %c0_i32_5 = arith.constant 0 : i32
    %8 = arith.cmpi ne, %7, %c0_i32_5 : i32
    scf.if %8 {
      %c0_8 = arith.constant 0 : index
      %c0_9 = arith.constant 0 : index
      %12 = vector.load %arg6[%c0_8, %c0_9] : memref<8x512xf32, #tpu.memory_space<vmem>>, vector<8x512xf32>
      %13 = arith.addf %12, %2 : vector<8x512xf32>
      %c0_10 = arith.constant 0 : index
      %c0_11 = arith.constant 0 : index
      %14 = vector.load %arg6[%c0_10, %c0_11] : memref<8x512xf32, #tpu.memory_space<vmem>>, vector<8x512xf32>
      tpu.vector_store %arg6[%c0_10, %c0_11], %13 {strides = array<i32>} : memref<8x512xf32, #tpu.memory_space<vmem>>, vector<8x512xf32>,
    } else {
    }
    %c0_i32_6 = arith.constant 0 : i32
    %9 = arith.cmpi eq, %arg2, %c0_i32_6 : i32
    %10 = arith.extui %9 : i1 to i32
    %c0_i32_7 = arith.constant 0 : i32
    %11 = arith.cmpi ne, %10, %c0_i32_7 : i32
    scf.if %11 {
      %c0_8 = arith.constant 0 : index
      %c0_9 = arith.constant 0 : index
      %12 = vector.load %arg6[%c0_8, %c0_9] : memref<8x512xf32, #tpu.memory_space<vmem>>, vector<8x512xf32>
      %cst_10 = arith.constant 0.0883883461 : f32
      %13 = vector.broadcast %cst_10 : f32 to vector<8x512xf32>
      %14 = arith.mulf %12, %13 : vector<8x512xf32>
      %c0_11 = arith.constant 0 : index
      %c0_12 = arith.constant 0 : index
      %15 = vector.load %arg5[%c0_11, %c0_12] : memref<1x512xf32, #tpu.memory_space<vmem>>, vector<1x512xf32>
      %16 = vector.broadcast %15 : vector<1x512xf32> to vector<8x512xf32>
      %17 = arith.addf %14, %16 : vector<8x512xf32>
      %c0_13 = arith.constant 0 : index
      %c0_14 = arith.constant 0 : index
      %18 = vector.load %arg6[%c0_13, %c0_14] : memref<8x512xf32, #tpu.memory_space<vmem>>, vector<8x512xf32>
      tpu.vector_store %arg6[%c0_13, %c0_14], %17 {strides = array<i32>} : memref<8x512xf32, #tpu.memory_space<vmem>>, vector<8x512xf32>,
    } else {
    }
    return
  }
  func.func @transform_0(%arg0: i32, %arg1: i32, %arg2: i32) -> (i32, i32) {
    %c0_i32 = arith.constant 0 : i32
    return %arg0, %arg2 : i32, i32
  }
  func.func @transform_1(%arg0: i32, %arg1: i32, %arg2: i32) -> (i32, i32) {
    %c0_i32 = arith.constant 0 : i32
    return %arg2, %arg1 : i32, i32
  }
  func.func @transform_2(%arg0: i32, %arg1: i32, %arg2: i32) -> (i32, i32) {
    %c0_i32 = arith.constant 0 : i32
    %c0_i32_0 = arith.constant 0 : i32
    return %c0_i32, %arg1 : i32, i32
  }
  func.func @transform_3(%arg0: i32, %arg1: i32, %arg2: i32) -> (i32, i32) {
    %c0_i32 = arith.constant 0 : i32
    return %arg0, %arg1 : i32, i32
  }
}

</mosaic_0001>

<bundles_post_ra>
// kernel: apply.1
= control target key start
LH: loop header
LB: loop body
LE: loop exit
PB: predicated region body
PF: predicated region fallthrough
CT: control target
= control target key end

     0   :  { %8 = vsyncpa [#allocation3], 0  ;;  %s1333_s0 = inlined_call_operand.vmem [shape: f32[8,256], index: 0, kind: input, shape index: {}]   ;;  %s1334_s1 = inlined_call_operand.hbm [shape: f32[256,1024], index: 1, kind: input, shape index: {}]   ;;  %s1335_s2 = inlined_call_operand.vmem [shape: f32[1,1024], index: 2, kind: input, shape index: {}]   ;;  %s1336_s3 = inlined_call_operand.vmem [shape: f32[8,1024], index: 3, kind: output, shape index: {}]  }
   0x1   :  { %10 = vsyncpa [#allocation3 + $0x1], 0  ;;  %s1056_s12 = smov 0   ;;  %s1058_s13 = smov 0  }
   0x2   :  { %s1060_s14 = smov 0   ;;  %s1062_s15 = smov 0  }
   0x3   :  { %s1064_s16 = smov 0   ;;  %s1066_s17 = smov 0  }
   0x4 LB: > { %s748_s18 = sadd.s32 4294967295, %s1030_s17   ;;  %s31_s19 = sadd.s32 1, %s1026_s16  ;;  %s1030_s17 = sphi %s1066_s17, %s16_s17   ;;  %s1026_s16 = sphi %s1064_s16, %s1345_s16   ;;  %s1022_s15 = sphi %s1062_s15, %s1344_s15   ;;  %s1018_s14 = sphi %s1060_s14, %s1343_s14   ;;  %s1014_s13 = sphi %s1058_s13, %s1342_s13   ;;  %s1010_s12 = sphi %s1056_s12, %s1341_s12  }
   0x5   : > { %p33_p0 = scmp.ge.s32.totalorder %s31_s19, 2  ;;  %s72_s20 = sadd.s32 1, %s1018_s14 }
   0x6   : > { %p79_p1 = scmp.ne.s32.totalorder %s1018_s14, %s1014_s13  ;;  %p80_p2 = scmp.eq.s32.totalorder %s1030_s17, 0 }
   0x7   : > { %s1347_s19 = smov (%p33_p0, %s31_s19), 0  ;;  %p85_p4 = scmp.ne.s32.totalorder %s1014_s13, %s1010_s12 }
   0x8   : > { %p1092_p3 = por %p80_p2, %p79_p1  ;;  %s68_s22 = ssub.s32 %s1026_s16, %s1347_s19 }
   0x9   : > { %p86_p5 = scmp.eq.s32.totalorder %s748_s18, 0  ;;  %p70_p6 = scmp.eq.s32.totalorder %s68_s22, 0 }
   0xa   : > { %p898_p8 = scmp.lt.s32.totalorder %s1030_s17, 2  ;;  %s176_s25 = sand.u32 1, %s1018_s14  }
   0xb   : > { %p1099_p7 = por %p86_p5, %p85_p4  ;;  %s763_s26 = sshll.u32 %s1026_s16, 9 }
   0xc   : > { %s1105_s24 = scalar_select %p70_p6, %s1018_s14, %s72_s20  }
   0xd   : > { %s753_s27 = sshll.u32 %s176_s25, 10  ;;  %s1112_s30 = scalar_lea.hbm %s1334_s1, %s763_s26 }
   0xe   : > { %s180_s4 = scalar_lea.vmem [#allocation2], %s753_s27  ;;  %p1116_p9 = pnand %p898_p8, %p1092_p3 }
   0xf   : > { %s190_s5 = sshll.u32 %s180_s4, 4  ;;  %s1123_s7 = scalar_lea.sflag [#allocation3], %s176_s25  ;;  %s1120_s5 = int_to_ptr.vmem [resolvable:$true] %s190_s5 }
  0x10   : > { %s950_s8 = scalar_lea.hbm %s1112_s30, 16384  ;;  %p952_p12 = pneg %p1116_p9 }
  0x11   : > { %p951_p11 = scmp.ne.s32.totalorder %s1112_s30, %s950_s8  ;;  %s955_s11 = scalar_lea.hbm %s1334_s1, 32768 }
  0x12   : > { %p956_p1 = scmp.lt.u32.totalorder %s1112_s30, %s1334_s1  ;;  %p957_p2 = scmp.lt.u32.totalorder %s955_s11, %s950_s8 }
  0x13   : > { %p953_p13 = pnand %p952_p12, %p951_p11  ;;  %p959_p4 = scmp.lt.u32.totalorder %s950_s8, %s1112_s30 }
  0x14   : > { %p958_p3 = por %p957_p2, %p956_p1 }
  0x15   : > { %p954_p0 = pneg %p953_p13 }
  0x16   : > { %p960_p5 = por %p959_p4, %p958_p3 }
  0x18   : > { %p961_p6 = pnand %p960_p5, %p954_p0 }
  0x1a   : > { %964 = shalt.err (!%p961_p6)
}
  0x1b   : > { %s965_s20 = scalar_lea.vmem %s1120_s5, 16384  ;;  %s1032_s21 = smov [#allocation2]  }
  0x1c   : > { %p966_p8 = scmp.ne.s32.totalorder %s1120_s5, %s965_s20  ;;  %s970_s22 = sshll.u32 %s1032_s21, 4  ;;  %s971_s22 = int_to_ptr.vmem [resolvable:$false] %s970_s22 }
  0x1d   : > { %s972_s25 = scalar_lea.vmem %s971_s22, 32768  ;;  %p973_p10 = scmp.lt.s32.totalorder %s1120_s5, %s971_s22 }
  0x1e   : > { %p968_p11 = pnand %p966_p8, %p952_p12  ;;  %p974_p1 = scmp.lt.s32.totalorder %s972_s25, %s965_s20 }
  0x20   : > { %p969_p13 = pneg %p968_p11  ;;  %p975_p2 = por %p974_p1, %p973_p10 }
  0x22   : > { %p976_p3 = pnand %p975_p2, %p969_p13 }
  0x24   : > { %979 = shalt.err (!%p976_p3)
}
  0x25   : > { %s1033_s26 = smov 1024   ;;  %s1034_s27 = smov 512  }
  0x26   : > { %s1035_s28 = smov 32   ;;  %p206_p12 = scmp.lt.s32.totalorder %s1030_s17, 3 }
  0x27   : > { %897 = dma.hbm_to_vmem [thread:$0]  (!%p1116_p9), %s1112_s30, 16384, %s1120_s5, %s1123_s7, %s1033_s26, %s1034_s27, %s1035_s28  }
  0x28   : > { %p1340_p0 = scmp.ge.s32.totalorder %s1030_s17, 1 }
  0x2a   : > { %p207_p4 = pnand %p1340_p0, %p206_p12 }
  0x2b   : > { %s212_s29 = sand.u32 (!%p207_p4), 1, %s1014_s13  }
  0x2c   : > { %210 = sbr.rel (%p207_p4) target bundleno = 346 (0x15a), region = 32  ;;  %s757_s4 = sshll.u32 (!%p207_p4), %s212_s29, 10 }
  0x2d   : > { %s213_s8 = scalar_lea.sflag (!%p207_p4), [#allocation3], %s212_s29  ;;  %s1155_s9 = scalar_lea.vmem (!%p207_p4), [#allocation2], %s757_s4 }
  0x33   : > { %1005 = dma.done.wait (%p1099_p7), %s213_s8, 16384  }
  0x34   : > { %1007 = vsyncadd (%p1099_p7), %s213_s8, 4294950912  ;;  %v286_v0 = vld [vmem:[%s1155_s9 + $0x8] sm:$0xff]  ;;  %v285_v2 = vld [vmem:[%s1155_s9] sm:$0xff]  ;;  %s758_s7 = sshll.u32 %s1022_s15, 2 }
  0x35   : > { %v290_v1 = vld [vmem:[%s1155_s9 + $0x28] sm:$0xff]  ;;  %v289_v4 = vld [vmem:[%s1155_s9 + $0x20] sm:$0xff]  ;;  %v288_v5 = vld [vmem:[%s1155_s9 + $0x18] sm:$0xff]  ;;  %p269_p7 = scmp.lt.s32.totalorder %s758_s7, 7 }
  0x36   : > { %v764_v3 = vpack.c.bf16 %v290_v1, %v286_v0  ;;  %v292_v6 = vld [vmem:[%s1155_s9 + $0x38] sm:$0xff]  ;;  %v766_v7 = vpack.c.bf16 %v289_v4, %v285_v2  ;;  %v287_v9 = vld [vmem:[%s1155_s9 + $0x10] sm:$0xff]  ;;  %v294_v11 = vld [vmem:[%s1155_s9 + $0x48] sm:$0xff] }
  0x37   : > { %v828_v8 = vpack.c.bf16 %v292_v6, %v288_v5  ;;  %v291_v10 = vld [vmem:[%s1155_s9 + $0x30] sm:$0xff]  ;;  %v298_v13 = vld [vmem:[%s1155_s9 + $0x68] sm:$0xff]  ;;  %v293_v14 = vld [vmem:[%s1155_s9 + $0x40] sm:$0xff]  ;;  %s1349_s7 = smov (!%p269_p7, %s758_s7), 7 }
  0x38   : > { %765 = vmatprep.subr.bf16.mxu0 %v764_v3  ;;  %v830_v12 = vpack.c.bf16 %v291_v10, %v287_v9  ;;  %v297_v15 = vld [vmem:[%s1155_s9 + $0x60] sm:$0xff]  ;;  %v768_v16 = vpack.c.bf16 %v298_v13, %v294_v11  ;;  %v296_v18 = vld [vmem:[%s1155_s9 + $0x58] sm:$0xff]  ;;  %v295_v20 = vld [vmem:[%s1155_s9 + $0x50] sm:$0xff]  ;;  %s760_s10 = sshll.u32 %s1349_s7, 3  ;;  %s271_s21 = scalar_lea.vmem %s1335_s2, %s1349_s7 }
  0x39   : > { %767 = vmatpush1.bf16.msra.mxu0 %v766_v7  ;;  %829 = vmatprep.subr.bf16.mxu1 %v828_v8  ;;  %v770_v17 = vpack.c.bf16 %v297_v15, %v293_v14  ;;  %v300_v19 = vld [vmem:[%s1155_s9 + $0x78] sm:$0xff]  ;;  %v299_v22 = vld [vmem:[%s1155_s9 + $0x70] sm:$0xff]  ;;  %v302_v23 = vld [vmem:[%s1155_s9 + $0x88] sm:$0xff]  ;;  %s1299_s18 = scalar_lea.vmem %s1336_s3, %s760_s10 }
  0x3a   : > { %831 = vmatpush1.bf16.msra.mxu1 %v830_v12  ;;  %v832_v21 = vpack.c.bf16 %v300_v19, %v296_v18  ;;  %v306_v24 = vld [vmem:[%s1155_s9 + $0xa8] sm:$0xff]  ;;  %769 = vmatprep.subr.bf16.mxu0 %v768_v16  ;;  %v834_v25 = vpack.c.bf16 %v299_v22, %v295_v20  ;;  %v301_v27 = vld [vmem:[%s1155_s9 + $0x80] sm:$0xff]  ;;  %v304_v29 = vld [vmem:[%s1155_s9 + $0x98] sm:$0xff] }
  0x3b   : > { %v772_v26 = vpack.c.bf16 %v306_v24, %v302_v23  ;;  %v305_v28 = vld [vmem:[%s1155_s9 + $0xa0] sm:$0xff]  ;;  %v308_v30 = vld [vmem:[%s1155_s9 + $0xb8] sm:$0xff]  ;;  %v303_v31 = vld [vmem:[%s1155_s9 + $0x90] sm:$0xff] }
  0x3c   : > { %833 = vmatprep.subr.bf16.mxu1 %v832_v21  ;;  %v307_v32 = vld [vmem:[%s1155_s9 + $0xb0] sm:$0xff]  ;;  %v774_v33 = vpack.c.bf16 %v305_v28, %v301_v27  ;;  %v836_v34 = vpack.c.bf16 %v308_v30, %v304_v29  ;;  %v310_v35 = vld [vmem:[%s1155_s9 + $0xc8] sm:$0xff]  ;;  %v309_v37 = vld [vmem:[%s1155_s9 + $0xc0] sm:$0xff] }
  0x3d   : > { %771 = vmatpush1.bf16.msra.mxu0 %v770_v17  ;;  %v314_v36 = vld [vmem:[%s1155_s9 + $0xe8] sm:$0xff]  ;;  %v838_v38 = vpack.c.bf16 %v307_v32, %v303_v31  ;;  %v313_v40 = vld [vmem:[%s1155_s9 + $0xe0] sm:$0xff]  ;;  %v312_v41 = vld [vmem:[%s1155_s9 + $0xd8] sm:$0xff] }
  0x3e   : > { %835 = vmatpush1.bf16.msra.mxu1 %v834_v25  ;;  %773 = vmatprep.subr.bf16.mxu0 %v772_v26  ;;  %v776_v39 = vpack.c.bf16 %v314_v36, %v310_v35  ;;  %v316_v42 = vld [vmem:[%s1155_s9 + $0xf8] sm:$0xff]  ;;  %v311_v44 = vld [vmem:[%s1155_s9 + $0xd0] sm:$0xff]  ;;  %v318_v46 = vld [vmem:[%s1155_s9 + $0x108] sm:$0xff]  ;;  %v778_v48 = vpack.c.bf16 %v313_v40, %v309_v37 }
  0x3f   : > { %837 = vmatprep.subr.bf16.mxu1 %v836_v34  ;;  %v840_v43 = vpack.c.bf16 %v316_v42, %v312_v41  ;;  %v315_v45 = vld [vmem:[%s1155_s9 + $0xf0] sm:$0xff]  ;;  %v322_v47 = vld [vmem:[%s1155_s9 + $0x128] sm:$0xff]  ;;  %v320_v49 = vld [vmem:[%s1155_s9 + $0x118] sm:$0xff] }
  0x40   : > { %v324_v50 = vld [vmem:[%s1155_s9 + $0x138] sm:$0xff]  ;;  %v842_v51 = vpack.c.bf16 %v315_v45, %v311_v44  ;;  %v780_v52 = vpack.c.bf16 %v322_v47, %v318_v46  ;;  %v317_v53 = vld [vmem:[%s1155_s9 + $0x100] sm:$0xff]  ;;  %v319_v55 = vld [vmem:[%s1155_s9 + $0x110] sm:$0xff] }
  0x41   : > { %775 = vmatpush1.bf16.msra.mxu0 %v774_v33  ;;  %v321_v54 = vld [vmem:[%s1155_s9 + $0x120] sm:$0xff]  ;;  %v844_v56 = vpack.c.bf16 %v324_v50, %v320_v49  ;;  %v323_v57 = vld [vmem:[%s1155_s9 + $0x130] sm:$0xff]  ;;  %v326_v58 = vld [vmem:[%s1155_s9 + $0x148] sm:$0xff] }
  0x42   : > { %839 = vmatpush1.bf16.msra.mxu1 %v838_v38  ;;  %777 = vmatprep.subr.bf16.mxu0 %v776_v39  ;;  %v330_v59 = vld [vmem:[%s1155_s9 + $0x168] sm:$0xff]  ;;  %v328_v60 = vld [vmem:[%s1155_s9 + $0x158] sm:$0xff]  ;;  %v782_v62 = vpack.c.bf16 %v321_v54, %v317_v53  ;;  %v846_v63 = vpack.c.bf16 %v323_v57, %v319_v55  ;;  %v325_v1 = vld [vmem:[%s1155_s9 + $0x140] sm:$0xff] }
  0x43   : > { %841 = vmatprep.subr.bf16.mxu1 %v840_v43  ;;  %v332_v61 = vld [vmem:[%s1155_s9 + $0x178] sm:$0xff]  ;;  %v784_v0 = vpack.c.bf16 %v330_v59, %v326_v58  ;;  %v329_v2 = vld [vmem:[%s1155_s9 + $0x160] sm:$0xff]  ;;  %v327_v3 = vld [vmem:[%s1155_s9 + $0x150] sm:$0xff] }
  0x44   : > { %v848_v4 = vpack.c.bf16 %v332_v61, %v328_v60  ;;  %v331_v5 = vld [vmem:[%s1155_s9 + $0x170] sm:$0xff]  ;;  %v334_v6 = vld [vmem:[%s1155_s9 + $0x188] sm:$0xff]  ;;  %v336_v8 = vld [vmem:[%s1155_s9 + $0x198] sm:$0xff]  ;;  %v786_v10 = vpack.c.bf16 %v329_v2, %v325_v1 }
  0x45   : > { %779 = vmatpush1.bf16.msra.mxu0 %v778_v48  ;;  %v338_v7 = vld [vmem:[%s1155_s9 + $0x1a8] sm:$0xff]  ;;  %v340_v9 = vld [vmem:[%s1155_s9 + $0x1b8] sm:$0xff]  ;;  %v850_v11 = vpack.c.bf16 %v331_v5, %v327_v3  ;;  %v333_v13 = vld [vmem:[%s1155_s9 + $0x180] sm:$0xff] }
  0x46   : > { %843 = vmatpush1.bf16.msra.mxu1 %v842_v51  ;;  %781 = vmatprep.subr.bf16.mxu0 %v780_v52  ;;  %v788_v12 = vpack.c.bf16 %v338_v7, %v334_v6  ;;  %v337_v14 = vld [vmem:[%s1155_s9 + $0x1a0] sm:$0xff]  ;;  %v335_v15 = vld [vmem:[%s1155_s9 + $0x190] sm:$0xff]  ;;  %v852_v16 = vpack.c.bf16 %v340_v9, %v336_v8  ;;  %v342_v18 = vld [vmem:[%s1155_s9 + $0x1c8] sm:$0xff] }
  0x47   : > { %845 = vmatprep.subr.bf16.mxu1 %v844_v56  ;;  %v339_v17 = vld [vmem:[%s1155_s9 + $0x1b0] sm:$0xff]  ;;  %v346_v19 = vld [vmem:[%s1155_s9 + $0x1e8] sm:$0xff]  ;;  %v344_v20 = vld [vmem:[%s1155_s9 + $0x1d8] sm:$0xff]  ;;  %v790_v22 = vpack.c.bf16 %v337_v14, %v333_v13 }
  0x48   : > { %v348_v21 = vld [vmem:[%s1155_s9 + $0x1f8] sm:$0xff]  ;;  %v854_v23 = vpack.c.bf16 %v339_v17, %v335_v15  ;;  %v792_v24 = vpack.c.bf16 %v346_v19, %v342_v18  ;;  %v341_v25 = vld [vmem:[%s1155_s9 + $0x1c0] sm:$0xff]  ;;  %v343_v27 = vld [vmem:[%s1155_s9 + $0x1d0] sm:$0xff] }
  0x49   : > { %783 = vmatpush1.bf16.msra.mxu0 %v782_v62  ;;  %v345_v26 = vld [vmem:[%s1155_s9 + $0x1e0] sm:$0xff]  ;;  %v856_v28 = vpack.c.bf16 %v348_v21, %v344_v20  ;;  %v347_v29 = vld [vmem:[%s1155_s9 + $0x1f0] sm:$0xff]  ;;  %v350_v30 = vld [vmem:[%s1155_s9 + $0x208] sm:$0xff] }
  0x4a   : > { %847 = vmatpush1.bf16.msra.mxu1 %v846_v63  ;;  %785 = vmatprep.subr.bf16.mxu0 %v784_v0  ;;  %v354_v31 = vld [vmem:[%s1155_s9 + $0x228] sm:$0xff]  ;;  %v352_v32 = vld [vmem:[%s1155_s9 + $0x218] sm:$0xff]  ;;  %v794_v34 = vpack.c.bf16 %v345_v26, %v341_v25  ;;  %v858_v35 = vpack.c.bf16 %v347_v29, %v343_v27  ;;  %v349_v37 = vld [vmem:[%s1155_s9 + $0x200] sm:$0xff] }
  0x4b   : > { %849 = vmatprep.subr.bf16.mxu1 %v848_v4  ;;  %v356_v33 = vld [vmem:[%s1155_s9 + $0x238] sm:$0xff]  ;;  %v796_v36 = vpack.c.bf16 %v354_v31, %v350_v30  ;;  %v353_v38 = vld [vmem:[%s1155_s9 + $0x220] sm:$0xff]  ;;  %v351_v39 = vld [vmem:[%s1155_s9 + $0x210] sm:$0xff] }
  0x4c   : > { %v860_v40 = vpack.c.bf16 %v356_v33, %v352_v32  ;;  %v355_v41 = vld [vmem:[%s1155_s9 + $0x230] sm:$0xff]  ;;  %v358_v42 = vld [vmem:[%s1155_s9 + $0x248] sm:$0xff]  ;;  %v360_v44 = vld [vmem:[%s1155_s9 + $0x258] sm:$0xff]  ;;  %v798_v46 = vpack.c.bf16 %v353_v38, %v349_v37 }
  0x4d   : > { %787 = vmatpush1.bf16.msra.mxu0 %v786_v10  ;;  %v362_v43 = vld [vmem:[%s1155_s9 + $0x268] sm:$0xff]  ;;  %v364_v45 = vld [vmem:[%s1155_s9 + $0x278] sm:$0xff]  ;;  %v862_v47 = vpack.c.bf16 %v355_v41, %v351_v39  ;;  %v357_v49 = vld [vmem:[%s1155_s9 + $0x240] sm:$0xff] }
  0x4e   : > { %851 = vmatpush1.bf16.msra.mxu1 %v850_v11  ;;  %789 = vmatprep.subr.bf16.mxu0 %v788_v12  ;;  %v800_v48 = vpack.c.bf16 %v362_v43, %v358_v42  ;;  %v361_v50 = vld [vmem:[%s1155_s9 + $0x260] sm:$0xff]  ;;  %v359_v51 = vld [vmem:[%s1155_s9 + $0x250] sm:$0xff]  ;;  %v864_v52 = vpack.c.bf16 %v364_v45, %v360_v44  ;;  %v366_v54 = vld [vmem:[%s1155_s9 + $0x288] sm:$0xff] }
  0x4f   : > { %853 = vmatprep.subr.bf16.mxu1 %v852_v16  ;;  %v363_v53 = vld [vmem:[%s1155_s9 + $0x270] sm:$0xff]  ;;  %v370_v55 = vld [vmem:[%s1155_s9 + $0x2a8] sm:$0xff]  ;;  %v368_v56 = vld [vmem:[%s1155_s9 + $0x298] sm:$0xff]  ;;  %v802_v58 = vpack.c.bf16 %v361_v50, %v357_v49 }
  0x50   : > { %v372_v57 = vld [vmem:[%s1155_s9 + $0x2b8] sm:$0xff]  ;;  %v866_v59 = vpack.c.bf16 %v363_v53, %v359_v51  ;;  %v804_v60 = vpack.c.bf16 %v370_v55, %v366_v54  ;;  %v365_v61 = vld [vmem:[%s1155_s9 + $0x280] sm:$0xff]  ;;  %v367_v63 = vld [vmem:[%s1155_s9 + $0x290] sm:$0xff] }
  0x51   : > { %791 = vmatpush1.bf16.msra.mxu0 %v790_v22  ;;  %v369_v62 = vld [vmem:[%s1155_s9 + $0x2a0] sm:$0xff]  ;;  %v868_v0 = vpack.c.bf16 %v372_v57, %v368_v56  ;;  %v371_v1 = vld [vmem:[%s1155_s9 + $0x2b0] sm:$0xff]  ;;  %v374_v2 = vld [vmem:[%s1155_s9 + $0x2c8] sm:$0xff] }
  0x52   : > { %855 = vmatpush1.bf16.msra.mxu1 %v854_v23  ;;  %793 = vmatprep.subr.bf16.mxu0 %v792_v24  ;;  %v378_v3 = vld [vmem:[%s1155_s9 + $0x2e8] sm:$0xff]  ;;  %v376_v4 = vld [vmem:[%s1155_s9 + $0x2d8] sm:$0xff]  ;;  %v806_v6 = vpack.c.bf16 %v369_v62, %v365_v61  ;;  %v373_v7 = vld [vmem:[%s1155_s9 + $0x2c0] sm:$0xff]  ;;  %v870_v8 = vpack.c.bf16 %v371_v1, %v367_v63 }
  0x53   : > { %857 = vmatprep.subr.bf16.mxu1 %v856_v28  ;;  %v380_v5 = vld [vmem:[%s1155_s9 + $0x2f8] sm:$0xff]  ;;  %v808_v9 = vpack.c.bf16 %v378_v3, %v374_v2  ;;  %v377_v10 = vld [vmem:[%s1155_s9 + $0x2e0] sm:$0xff]  ;;  %v375_v11 = vld [vmem:[%s1155_s9 + $0x2d0] sm:$0xff]  ;;  %v592_v3 = vlaneseq }
  0x54   : > { %v379_v12 = vld [vmem:[%s1155_s9 + $0x2f0] sm:$0xff]  ;;  %v872_v13 = vpack.c.bf16 %v380_v5, %v376_v4  ;;  %v382_v14 = vld [vmem:[%s1155_s9 + $0x308] sm:$0xff]  ;;  %v384_v17 = vld [vmem:[%s1155_s9 + $0x318] sm:$0xff]  ;;  %v810_v19 = vpack.c.bf16 %v377_v10, %v373_v7 }
  0x55   : > { %795 = vmatpush1.bf16.msra.mxu0 %v794_v34  ;;  %v386_v15 = vld [vmem:[%s1155_s9 + $0x328] sm:$0xff]  ;;  %v388_v18 = vld [vmem:[%s1155_s9 + $0x338] sm:$0xff]  ;;  %v874_v20 = vpack.c.bf16 %v379_v12, %v375_v11  ;;  %v381_v22 = vld [vmem:[%s1155_s9 + $0x300] sm:$0xff]  ;;  %v593_v7 = vshrl.u32 %v592_v3, 7 }
  0x56   : > { %859 = vmatpush1.bf16.msra.mxu1 %v858_v35  ;;  %797 = vmatprep.subr.bf16.mxu0 %v796_v36  ;;  %v284_v16 = vld [vmem:[%s1333_s0 + $0x8] sm:$0xff]  ;;  %v812_v21 = vpack.c.bf16 %v386_v15, %v382_v14  ;;  %v385_v23 = vld [vmem:[%s1155_s9 + $0x320] sm:$0xff]  ;;  %v383_v24 = vld [vmem:[%s1155_s9 + $0x310] sm:$0xff]  ;;  %v876_v25 = vpack.c.bf16 %v388_v18, %v384_v17 }
  0x57   : > { %861 = vmatprep.subr.bf16.mxu1 %v860_v40  ;;  %477 = vmatprep.mubr.f32.mxu0 %v284_v16  ;;  %v387_v26 = vld [vmem:[%s1155_s9 + $0x330] sm:$0xff]  ;;  %v390_v27 = vld [vmem:[%s1155_s9 + $0x348] sm:$0xff]  ;;  %v392_v29 = vld [vmem:[%s1155_s9 + $0x358] sm:$0xff]  ;;  %v814_v31 = vpack.c.bf16 %v385_v23, %v381_v22  ;;  %v602_v10 = vsub.s32 2, %v593_v7  ;;  %v606_v12 = vsub.s32 3, %v593_v7 }
  0x58   : > { %548 = vmatprep.mubr.f32.mxu1 %v284_v16  ;;  %v394_v28 = vld [vmem:[%s1155_s9 + $0x368] sm:$0xff]  ;;  %v396_v30 = vld [vmem:[%s1155_s9 + $0x378] sm:$0xff]  ;;  %v878_v32 = vpack.c.bf16 %v387_v26, %v383_v24  ;;  %v389_v34 = vld [vmem:[%s1155_s9 + $0x340] sm:$0xff] }
  0x59   : > { %799 = vmatpush1.bf16.msra.mxu0 %v798_v46  ;;  %v816_v33 = vpack.c.bf16 %v394_v28, %v390_v27  ;;  %v393_v35 = vld [vmem:[%s1155_s9 + $0x360] sm:$0xff]  ;;  %v391_v36 = vld [vmem:[%s1155_s9 + $0x350] sm:$0xff]  ;;  %v880_v37 = vpack.c.bf16 %v396_v30, %v392_v29  ;;  %v398_v39 = vld [vmem:[%s1155_s9 + $0x388] sm:$0xff] }
  0x5a   : > { %863 = vmatpush1.bf16.msra.mxu1 %v862_v47  ;;  %801 = vmatprep.subr.bf16.mxu0 %v800_v48  ;;  %v395_v38 = vld [vmem:[%s1155_s9 + $0x370] sm:$0xff]  ;;  %v402_v40 = vld [vmem:[%s1155_s9 + $0x3a8] sm:$0xff]  ;;  %v400_v41 = vld [vmem:[%s1155_s9 + $0x398] sm:$0xff]  ;;  %v818_v43 = vpack.c.bf16 %v393_v35, %v389_v34 }
  0x5b   : > { %865 = vmatprep.subr.bf16.mxu1 %v864_v52  ;;  %v404_v42 = vld [vmem:[%s1155_s9 + $0x3b8] sm:$0xff]  ;;  %v882_v44 = vpack.c.bf16 %v395_v38, %v391_v36  ;;  %v820_v45 = vpack.c.bf16 %v402_v40, %v398_v39  ;;  %v397_v46 = vld [vmem:[%s1155_s9 + $0x380] sm:$0xff]  ;;  %v399_v48 = vld [vmem:[%s1155_s9 + $0x390] sm:$0xff] }
  0x5c   : > { %v401_v47 = vld [vmem:[%s1155_s9 + $0x3a0] sm:$0xff]  ;;  %v884_v49 = vpack.c.bf16 %v404_v42, %v400_v41  ;;  %v403_v50 = vld [vmem:[%s1155_s9 + $0x3b0] sm:$0xff]  ;;  %v406_v51 = vld [vmem:[%s1155_s9 + $0x3c8] sm:$0xff] }
  0x5d   : > { %803 = vmatpush1.bf16.msra.mxu0 %v802_v58  ;;  %v410_v52 = vld [vmem:[%s1155_s9 + $0x3e8] sm:$0xff]  ;;  %v408_v53 = vld [vmem:[%s1155_s9 + $0x3d8] sm:$0xff]  ;;  %v822_v55 = vpack.c.bf16 %v401_v47, %v397_v46  ;;  %v886_v56 = vpack.c.bf16 %v403_v50, %v399_v48  ;;  %v405_v58 = vld [vmem:[%s1155_s9 + $0x3c0] sm:$0xff] }
  0x5e   : > { %867 = vmatpush1.bf16.msra.mxu1 %v866_v59  ;;  %805 = vmatprep.subr.bf16.mxu0 %v804_v60  ;;  %v412_v54 = vld [vmem:[%s1155_s9 + $0x3f8] sm:$0xff]  ;;  %v824_v57 = vpack.c.bf16 %v410_v52, %v406_v51  ;;  %v409_v59 = vld [vmem:[%s1155_s9 + $0x3e0] sm:$0xff]  ;;  %v407_v61 = vld [vmem:[%s1155_s9 + $0x3d0] sm:$0xff] }
  0x5f   : > { %869 = vmatprep.subr.bf16.mxu1 %v868_v0  ;;  %v888_v60 = vpack.c.bf16 %v412_v54, %v408_v53  ;;  %v411_v62 = vld [vmem:[%s1155_s9 + $0x3f0] sm:$0xff]  ;;  %v826_v63 = vpack.c.bf16 %v409_v59, %v405_v58  ;;  %v283_v1 = vld [vmem:[%s1333_s0] sm:$0xff] }
  0x60   : > { %v890_v0 = vpack.c.bf16 %v411_v62, %v407_v61  ;;  %v590_v11 = vld [vmem:[%s271_s21] sm:$0xf] }
  0x61   : > { %807 = vmatpush1.bf16.msra.mxu0 %v806_v6  ;;  %v607_v23 = vrot.slane %v590_v11, %v606_v12 }
  0x62   : > { %871 = vmatpush1.bf16.msra.mxu1 %v870_v8  ;;  %809 = vmatprep.subr.bf16.mxu0 %v808_v9  ;;  %v594_v8 = vsub.s32 0, %v593_v7  ;;  %v598_v9 = vsub.s32 1, %v593_v7 }
  0x63   : > { %873 = vmatprep.subr.bf16.mxu1 %v872_v13 }
  0x64   : > { %v595_v13 = vrot.slane %v590_v11, %v594_v8  ;;  %v599_v14 = vrot.slane %v590_v11, %v598_v9 }
  0x65   : > { %811 = vmatpush1.bf16.msra.mxu0 %v810_v19 }
  0x66   : > { %875 = vmatpush1.bf16.msra.mxu1 %v874_v20  ;;  %813 = vmatprep.subr.bf16.mxu0 %v812_v21  ;;  %v603_v21 = vrot.slane %v590_v11, %v602_v10 }
  0x67   : > { %877 = vmatprep.subr.bf16.mxu1 %v876_v25 }
  0x69   : > { %815 = vmatpush1.bf16.msra.mxu0 %v814_v31 }
  0x6a   : > { %879 = vmatpush1.bf16.msra.mxu1 %v878_v32  ;;  %817 = vmatprep.subr.bf16.mxu0 %v816_v33 }
  0x6b   : > { %881 = vmatprep.subr.bf16.mxu1 %v880_v37 }
  0x6d   : > { %819 = vmatpush1.bf16.msra.mxu0 %v818_v43 }
  0x6e   : > { %883 = vmatpush1.bf16.msra.mxu1 %v882_v44  ;;  %821 = vmatprep.subr.bf16.mxu0 %v820_v45 }
  0x6f   : > { %885 = vmatprep.subr.bf16.mxu1 %v884_v49 }
  0x71   : > { %823 = vmatpush1.bf16.msra.mxu0 %v822_v55 }
  0x72   : > { %887 = vmatpush1.bf16.msra.mxu1 %v886_v56  ;;  %825 = vmatprep.subr.bf16.mxu0 %v824_v57 }
  0x73   : > { %889 = vmatprep.subr.bf16.mxu1 %v888_v60 }
  0x75   : > { %827 = vmatpush1.bf16.msra.mxu0 %v826_v63 }
  0x76   : > { %891 = vmatpush1.bf16.msra.mxu1 %v890_v0 }
  0x78   : > { %478 = vmatmul.mubr.f32.vlgmr.msra.gmra.mrb[0].mxu0 %v283_v1 }
  0x79   : > { %549 = vmatmul.mubr.f32.vlgmr.msra.gmra.mrb[0].mxu1 %v283_v1 }
 0x14b   : > { %v479_v2 = vpop.f32.mrb[0].mxu0 }
 0x14c   : > { %559 = vst [vmem:[%s1299_s18] sm:$0xff] %v479_v2  ;;  %v481_v4 = vpop.f32.mrb[1].mxu0  ;;  %v550_v5 = vpop.f32.mrb[0].mxu1 }
 0x14d   : > { %560 = vst [vmem:[%s1299_s18 + $0x8] sm:$0xff] %v481_v4  ;;  %v552_v6 = vpop.f32.mrb[1].mxu1  ;;  %561 = vst [vmem:[%s1299_s18 + $0x10] sm:$0xff] %v550_v5 }
 0x14e   : > { %562 = vst [vmem:[%s1299_s18 + $0x18] sm:$0xff] %v552_v6  ;;  %v589_v22 = vmul.f32 0.088388346, %v552_v6 }
 0x150   : > { %v615_v27 = vadd.f32 %v607_v23, %v589_v22 }
 0x152   : > { %619 = vst [vmem:[%s1299_s18 + $0x18] sm:$0xff] %v615_v27 }
 0x153   : > { %v582_v15 = vld [vmem:[%s1299_s18] sm:$0xff] }
 0x154   : > { %v583_v16 = vld [vmem:[%s1299_s18 + $0x8] sm:$0xff]  ;;  %v584_v17 = vld [vmem:[%s1299_s18 + $0x10] sm:$0xff]  ;;  %v586_v18 = vmul.f32 0.088388346, %v582_v15 }
 0x155   : > { %v587_v19 = vmul.f32 0.088388346, %v583_v16  ;;  %v588_v20 = vmul.f32 0.088388346, %v584_v17 }
 0x156   : > { %v612_v24 = vadd.f32 %v595_v13, %v586_v18 }
 0x157   : > { %v613_v25 = vadd.f32 %v599_v14, %v587_v19  ;;  %v614_v26 = vadd.f32 %v603_v21, %v588_v20 }
 0x158   : > { %616 = vst [vmem:[%s1299_s18] sm:$0xff] %v612_v24 }
 0x159   : > { %617 = vst [vmem:[%s1299_s18 + $0x8] sm:$0xff] %v613_v25  ;;  %618 = vst [vmem:[%s1299_s18 + $0x10] sm:$0xff] %v614_v26 }
 0x15a PF: > { %s16_s17 = sadd.s32 1, %s1030_s17   ;;  %s1341_s12 = smov %s1014_s13 }
 0x15b   : > { %p13_p9 = scmp.ge.s32.totalorder %s16_s17, 4   ;;  %s1342_s13 = smov %s1018_s14 }
 0x15c   : > { %s1343_s14 = smov %s1105_s24  ;;  %s1344_s15 = smov %s1026_s16 }
 0x15d   : > { %s1345_s16 = smov %s1347_s19  ;;  %15 = sbr.rel (!%p13_p9) target bundleno = 4 (0x4), region = 90 }
 0x164   :  { %650 = vsyncpa [#allocation3], 1 }
 0x165   :  { %652 = vsyncpa [#allocation3 + $0x1], 1 }

</bundles_post_ra>
